<compile_context>
chip_gen: v7x
topology: tpu7x:2x2x1
jax: 0.10.0
libtpu: 0.0.40
codegen_flags: <defaults>
</compile_context>

<pallas_src>
import functools

import jax
import jax.numpy as jnp
from jax.experimental import pallas as pl
from jax.experimental.pallas import tpu as pltpu


_LANES = 128      # TPU lane width; head output padded to a multiple of this.
_SUBLANES = 8     # f32 sublane count.
_MAX_TK = 2048    # max K-tile width (lanes of the reduction dim).
_MAX_TM = 256     # max batch tile (matches v6e/v7x 256-wide MXU).
# Resident-weight budget: stay well under the v5e 16 MiB scoped-VMEM default
# (v6e/v7x defaults are 32 MiB), counting double-buffered inputs/outputs.
_VMEM_BUDGET = 12 * 1024 * 1024


def _cdiv(a, b):
    return (a + b - 1) // b


def _round_up(x, m):
    return _cdiv(x, m) * m


def _k_tiling(D):
    """Split round_up(D, 128) into the fewest <=_MAX_TK-wide 128-multiple tiles."""
    d128 = _round_up(D, _LANES)
    units = d128 // _LANES
    n_k = _cdiv(units, _MAX_TK // _LANES)
    tk = _cdiv(units, n_k) * _LANES
    d_pad = tk * _cdiv(d128, tk)
    return tk, d_pad


def _batch_tiling(B):
    b8 = _round_up(B, _SUBLANES)
    tm = min(_MAX_TM, b8)
    # Keep >= 2 batch tiles whenever possible so v7x's two TensorCores both
    # get work (batch axis is marked "parallel").
    if b8 > _SUBLANES and b8 // tm < 2:
        tm = _round_up(_cdiv(b8, 2), _SUBLANES)
    b_pad = _round_up(B, tm)
    return tm, b_pad


def _head_kernel_single(x_ref, w_ref, b_ref, out_ref):
    """Single K step: whole (resident) weight, no phases, no accumulator RMW."""
    x = x_ref[...].astype(w_ref.dtype)        # cast inside the kernel (VPU).
    out_ref[...] = (
        jnp.dot(x, w_ref[...], preferred_element_type=jnp.float32) + b_ref[...]
    )


def _head_kernel_tiled(x_ref, w_ref, b_ref, out_ref, *, tk, resident_w):
    """K-tiled matmul accumulating directly into the f32 out_ref."""
    k = pl.program_id(1)

    @pl.when(k == 0)
    def _init():
        out_ref[...] = jnp.zeros_like(out_ref)

    x = x_ref[...].astype(w_ref.dtype)
    if resident_w:
        start = pl.multiple_of(k * tk, _LANES)
        w = w_ref[pl.ds(start, tk), :]
    else:
        w = w_ref[...]
    out_ref[...] += jnp.dot(x, w, preferred_element_type=jnp.float32)

    @pl.when(k == pl.num_programs(1) - 1)
    def _finalize():
        out_ref[...] += b_ref[...]


@functools.partial(jax.jit, static_argnames=("num_act",))
def _priors_and_values(obs, w_p, b_p, *, num_act):
    """obs: [B, C, H, W]; w_p/b_p are pre-padded -> (priors [B, num_act], value [B, 1])."""
    out_dim = num_act + 1
    B = obs.shape[0]
    D = 1
    for s in obs.shape[1:]:
        D *= int(s)

    d_pad, n_pad = w_p.shape
    x_item = jnp.dtype(obs.dtype).itemsize
    w_item = jnp.dtype(w_p.dtype).itemsize

    tm, b_pad = _batch_tiling(B)
    tk, d_pad_expect = _k_tiling(D)
    assert d_pad_expect == d_pad, "padded weight inconsistent with K tiling"

    # Flatten row-major (== torch .view(B, -1)); pad only if actually needed.
    x = obs.reshape(B, D)
    if b_pad != B or d_pad != D:
        x = jnp.pad(x, ((0, b_pad - B), (0, d_pad - D)))

    # Advisory cost: logical (unpadded) flops / bytes.
    cost = pl.CostEstimate(
        flops=2 * B * D * out_dim,
        transcendentals=0,
        bytes_accessed=(
            B * D * x_item + D * out_dim * w_item + out_dim * 4 + B * out_dim * 4
        ),
    )

    n_k = d_pad // tk
    if n_k == 1:
        # Common case: one K step, resident weight (constant block index ->
        # DMA'd once, reused across every batch tile / both cores).
        out = pl.pallas_call(
            _head_kernel_single,
            out_shape=jax.ShapeDtypeStruct((b_pad, n_pad), jnp.float32),
            grid_spec=pltpu.PrefetchScalarGridSpec(
                num_scalar_prefetch=0,
                grid=(b_pad // tm,),
                in_specs=[
                    pl.BlockSpec((tm, d_pad), lambda i: (i, 0)),
                    pl.BlockSpec((d_pad, n_pad), lambda i: (0, 0)),
                    pl.BlockSpec((1, n_pad), lambda i: (0, 0)),
                ],
                out_specs=pl.BlockSpec((tm, n_pad), lambda i: (i, 0)),
            ),
            compiler_params=pltpu.CompilerParams(
                dimension_semantics=("parallel",),
            ),
            cost_estimate=cost,
        )(x, w_p, b_p)
    else:
        # Large D: keep the whole weight resident in VMEM if it fits the v5e
        # 16 MiB scoped default with headroom; otherwise stream it per K tile.
        resident_bytes = (
            2 * tm * tk * x_item          # double-buffered x tiles
            + 2 * d_pad * n_pad * w_item  # resident weight (count 2 buffers)
            + 2 * n_pad * 4               # bias
            + 2 * tm * n_pad * 4          # output tile
        )
        resident_w = resident_bytes <= _VMEM_BUDGET
        if resident_w:
            w_spec = pl.BlockSpec((d_pad, n_pad), lambda i, k: (0, 0))
        else:
            # TODO(synk): streamed weight is re-fetched once per batch tile for
            # very large D; acceptable here since that regime is rare for a
            # flattened-obs head.
            w_spec = pl.BlockSpec((tk, n_pad), lambda i, k: (k, 0))
        kern = functools.partial(_head_kernel_tiled, tk=tk, resident_w=resident_w)
        out = pl.pallas_call(
            kern,
            out_shape=jax.ShapeDtypeStruct((b_pad, n_pad), jnp.float32),
            grid_spec=pltpu.PrefetchScalarGridSpec(
                num_scalar_prefetch=0,
                grid=(b_pad // tm, n_k),  # reduction (K) axis last.
                in_specs=[
                    pl.BlockSpec((tm, tk), lambda i, k: (i, k)),
                    w_spec,
                    pl.BlockSpec((1, n_pad), lambda i, k: (0, 0)),
                ],
                out_specs=pl.BlockSpec((tm, n_pad), lambda i, k: (i, 0)),
            ),
            compiler_params=pltpu.CompilerParams(
                dimension_semantics=("parallel", "arbitrary"),
            ),
            cost_estimate=cost,
        )(x, w_p, b_p)

    priors = out[:B, :num_act]
    value = out[:B, num_act:out_dim]
    return priors, value


class BaseModelPallas:
    """Mirrors the BaseModel interface (get/set weights, device-agnostic)."""

    def __init__(self, config, obs_shape, num_act, device=None, amp=False):
        self.config = config
        self.obs_shape = tuple(obs_shape)  # (C, H, W)
        self.num_act = num_act
        self.device = device
        self.amp = amp

        c, h, w = self.obs_shape
        d = c * h * w
        key = jax.random.PRNGKey(0)
        kw, kb = jax.random.split(key)
        # TODO(synk): BaseModel.forward is abstract; only this minimal
        # priors+values linear head is implemented (no config-specific torso).
        self._weights = {
            "head.weight": jax.random.normal(kw, (d, num_act + 1), jnp.float32)
            * (1.0 / jnp.sqrt(d)),
            "head.bias": jax.random.normal(kb, (1, num_act + 1), jnp.float32) * 0.01,
        }
        self._prepare_padded()

    # --- weight padding/casting done ONCE, not per forward call ---
    def _prepare_padded(self):
        w = self._weights["head.weight"]
        b = self._weights["head.bias"]
        d, out_dim = w.shape
        n_pad = _round_up(out_dim, _LANES)
        _, d_pad = _k_tiling(d)
        compute_dtype = jnp.bfloat16 if self.amp else jnp.float32
        self._w_padded = jnp.pad(
            w.astype(compute_dtype), ((0, d_pad - d), (0, n_pad - out_dim))
        )
        self._b_padded = jnp.pad(
            b.astype(jnp.float32).reshape(1, out_dim), ((0, 0), (0, n_pad - out_dim))
        )

    def forward(self, obs):
        return self.compute_priors_and_values(obs)

    def compute_priors_and_values(self, obs):
        return _priors_and_values(
            obs, self._w_padded, self._b_padded, num_act=self.num_act
        )

    def get_weights(self):
        return {k: jax.device_get(v) for k, v in self._weights.items()}

    def set_weights(self, weights):
        self._weights = {k: jnp.asarray(v) for k, v in weights.items()}
        self._prepare_padded()


if __name__ == "__main__":
    # Small shapes consistent with an image-like obs: batch=2, channels=4, 16x16.
    B, C, H, W = 2, 4, 16, 16
    num_act = 8

    key = jax.random.PRNGKey(0)
    obs = jax.random.normal(key, (B, C, H, W), jnp.float32)

    # --- f32 path (amp=False), single-K-step resident-weight kernel ---
    model = BaseModelPallas(
        config=None, obs_shape=(C, H, W), num_act=num_act, amp=False
    )
    priors, value = model.compute_priors_and_values(obs)
    priors = jax.block_until_ready(priors)
    value = jax.block_until_ready(value)

    x = obs.reshape(B, -1)
    w = model._weights["head.weight"]
    b = model._weights["head.bias"]
    ref = x @ w + b
    assert priors.shape == (B, num_act) and value.shape == (B, 1)
    assert jnp.allclose(priors, ref[:, :num_act], atol=2e-3, rtol=2e-3)
    assert jnp.allclose(value, ref[:, num_act:], atol=2e-3, rtol=2e-3)

    # --- bf16 path (amp=True); compare against a bf16 JAX reference ---
    model_amp = BaseModelPallas(
        config=None, obs_shape=(C, H, W), num_act=num_act, amp=True
    )
    p16, v16 = model_amp.compute_priors_and_values(obs)
    p16 = jax.block_until_ready(p16)
    v16 = jax.block_until_ready(v16)
    ref16 = (
        jnp.dot(
            x.astype(jnp.bfloat16),
            w.astype(jnp.bfloat16),
            preferred_element_type=jnp.float32,
        )
        + b
    )
    assert p16.shape == (B, num_act) and v16.shape == (B, 1)
    assert jnp.allclose(p16, ref16[:, :num_act], atol=2e-2, rtol=2e-2)
    assert jnp.allclose(v16, ref16[:, num_act:], atol=2e-2, rtol=2e-2)

    # --- large-D path (D = 4*32*32 = 4096 > 2048) exercises the K-tiled kernel ---
    C2, H2, W2 = 4, 32, 32
    obs2 = jax.random.normal(jax.random.PRNGKey(1), (B, C2, H2, W2), jnp.float32)
    model2 = BaseModelPallas(
        config=None, obs_shape=(C2, H2, W2), num_act=num_act, amp=False
    )
    p2, v2 = model2.compute_priors_and_values(obs2)
    p2 = jax.block_until_ready(p2)
    v2 = jax.block_until_ready(v2)
    ref2 = obs2.reshape(B, -1) @ model2._weights["head.weight"] + model2._weights["head.bias"]
    assert jnp.allclose(p2, ref2[:, :num_act], atol=2e-3, rtol=2e-3)
    assert jnp.allclose(v2, ref2[:, num_act:], atol=2e-3, rtol=2e-3)

    print("KERNEL_OK")
</pallas_src>

<mosaic_0001>
module attributes {stable_mosaic.version = 11 : i64} {
  func.func @_head_kernel_single(%arg0: i32, %arg1: memref<8x1024xf32, #tpu.memory_space<vmem>>, %arg2: memref<1024x128xf32, #tpu.memory_space<vmem>>, %arg3: memref<1x128xf32, #tpu.memory_space<vmem>>, %arg4: memref<8x128xf32, #tpu.memory_space<vmem>>) attributes {dimension_semantics = [#tpu.dimension_semantics<parallel>], iteration_bounds = array<i64: 1>, scalar_prefetch = 0 : i64, scratch_operands = 0 : i64, tpu.core_type = #tpu.core_type<tc>, window_params = [{transform_indices = @transform_0, window_bounds = array<i64: 8, 1024>}, {pipeline_mode = #tpu.pipeline_mode<synchronous>, transform_indices = @transform_1, window_bounds = array<i64: 1024, 128>}, {pipeline_mode = #tpu.pipeline_mode<synchronous>, transform_indices = @transform_2, window_bounds = array<i64: 1, 128>}, {transform_indices = @transform_3, window_bounds = array<i64: 8, 128>}]} {
    %c0 = arith.constant 0 : index
    %c0_0 = arith.constant 0 : index
    %0 = vector.load %arg1[%c0, %c0_0] : memref<8x1024xf32, #tpu.memory_space<vmem>>, vector<8x1024xf32>
    %c0_1 = arith.constant 0 : index
    %c0_2 = arith.constant 0 : index
    %1 = vector.load %arg2[%c0_1, %c0_2] : memref<1024x128xf32, #tpu.memory_space<vmem>>, vector<1024x128xf32>
    %cst = arith.constant dense<0.000000e+00> : vector<8x128xf32>
    %2 = tpu.matmul %0, %1, %cst {dimension_numbers = #tpu.dot_dimension_numbers<[1], [0], [0], [1], [0, 0, 1, 1], [], []>} : vector<8x1024xf32>, vector<1024x128xf32>, vector<8x128xf32> -> vector<8x128xf32>
    %c0_3 = arith.constant 0 : index
    %c0_4 = arith.constant 0 : index
    %3 = vector.load %arg3[%c0_3, %c0_4] : memref<1x128xf32, #tpu.memory_space<vmem>>, vector<1x128xf32>
    %4 = vector.broadcast %3 : vector<1x128xf32> to vector<8x128xf32>
    %5 = arith.addf %2, %4 : vector<8x128xf32>
    %c0_5 = arith.constant 0 : index
    %c0_6 = arith.constant 0 : index
    %6 = vector.load %arg4[%c0_5, %c0_6] : memref<8x128xf32, #tpu.memory_space<vmem>>, vector<8x128xf32>
    tpu.vector_store %arg4[%c0_5, %c0_6], %5 {strides = array<i32>} : memref<8x128xf32, #tpu.memory_space<vmem>>, vector<8x128xf32>,
    return
  }
  func.func @transform_0(%arg0: i32) -> (i32, i32) {
    %c0_i32 = arith.constant 0 : i32
    %c0_i32_0 = arith.constant 0 : i32
    return %arg0, %c0_i32 : i32, i32
  }
  func.func @transform_1(%arg0: i32) -> (i32, i32) {
    %c0_i32 = arith.constant 0 : i32
    %c0_i32_0 = arith.constant 0 : i32
    %c0_i32_1 = arith.constant 0 : i32
    return %c0_i32, %c0_i32_0 : i32, i32
  }
  func.func @transform_2(%arg0: i32) -> (i32, i32) {
    %c0_i32 = arith.constant 0 : i32
    %c0_i32_0 = arith.constant 0 : i32
    %c0_i32_1 = arith.constant 0 : i32
    return %c0_i32, %c0_i32_0 : i32, i32
  }
  func.func @transform_3(%arg0: i32) -> (i32, i32) {
    %c0_i32 = arith.constant 0 : i32
    %c0_i32_0 = arith.constant 0 : i32
    return %arg0, %c0_i32 : i32, i32
  }
}

</mosaic_0001>

<bundles_post_ra>
// kernel: _priors_and_values.1
= control target key start
LH: loop header
LB: loop body
LE: loop exit
PB: predicated region body
PF: predicated region fallthrough
CT: control target
= control target key end

     0   :  { %8 = vsyncpa [#allocation3], 0  ;;  %s753_s12 = smov [#allocation2]   ;;  %s818_s0 = inlined_call_operand.vmem [shape: f32[8,1024], index: 0, kind: input, shape index: {}]   ;;  %s819_s1 = inlined_call_operand.hbm [shape: f32[1024,128], index: 1, kind: input, shape index: {}]   ;;  %s820_s2 = inlined_call_operand.vmem [shape: f32[1,128], index: 2, kind: input, shape index: {}]   ;;  %s821_s3 = inlined_call_operand.vmem [shape: f32[8,128], index: 3, kind: output, shape index: {}]  }
   0x1   :  { %s16_s13 = sshll.u32 %s753_s12, 4  ;;  %s729_s16 = scalar_lea.hbm %s819_s1, 16384  ;;  %s17_s13 = int_to_ptr.vmem [resolvable:$true] %s16_s13 }
   0x2   :  { %p730_p0 = scmp.ne.s32.totalorder %s819_s1, %s729_s16  ;;  %p733_p1 = scmp.lt.u32.totalorder %s729_s16, %s819_s1 }
   0x4   :  { %p735_p2 = pnand %p733_p1, %p730_p0 }
   0x6   :  { %738 = shalt.err (!%p735_p2)
}
   0x7   :  { %s739_s21 = scalar_lea.vmem %s17_s13, 16384  ;;  %p744_p4 = scmp.lt.s32.totalorder %s17_s13, %s17_s13 }
   0x8   :  { %p740_p3 = scmp.ne.s32.totalorder %s17_s13, %s739_s21  ;;  %p745_p5 = scmp.lt.s32.totalorder %s739_s21, %s739_s21 }
   0xa   :  { %p746_p6 = por %p745_p5, %p744_p4 }
   0xc   :  { %p747_p7 = pnand %p746_p6, %p740_p3 }
   0xe   :  { %750 = shalt.err (!%p747_p7)
}
   0xf   :  { %s754_s22 = smov 128   ;;  %s755_s23 = smov 8  }
  0x10   :  { %22 = dma.hbm_to_vmem [thread:$0]  %s819_s1, 16384, %s17_s13, [#allocation3], %s754_s22, %s754_s22, %s755_s23  }
  0x11   :  { %751 = dma.done.wait [#allocation3], 16384  }
  0x12   :  { %752 = vsyncadd [#allocation3], 4294950912  ;;  %v52_v0 = vld [vmem:[#allocation2 + $0x80] sm:$0xff]  ;;  %v53_v1 = vld [vmem:[#allocation2 + $0x88] sm:$0xff] }
  0x13   :  { %v36_v2 = vld [vmem:[#allocation2] sm:$0xff]  ;;  %v598_v3 = vpack.c.bf16 %v53_v1, %v52_v0  ;;  %v37_v4 = vld [vmem:[#allocation2 + $0x8] sm:$0xff]  ;;  %v54_v11 = vld [vmem:[#allocation2 + $0x90] sm:$0xff] }
  0x14   :  { %v84_v5 = vld [vmem:[#allocation2 + $0x180] sm:$0xff]  ;;  %v85_v6 = vld [vmem:[#allocation2 + $0x188] sm:$0xff]  ;;  %v600_v7 = vpack.c.bf16 %v37_v4, %v36_v2  ;;  %v55_v13 = vld [vmem:[#allocation2 + $0x98] sm:$0xff] }
  0x15   :  { %v630_v8 = vpack.c.bf16 %v85_v6, %v84_v5  ;;  %v68_v9 = vld [vmem:[#allocation2 + $0x100] sm:$0xff]  ;;  %v69_v10 = vld [vmem:[#allocation2 + $0x108] sm:$0xff]  ;;  %599 = vmatprep.subr.bf16.mxu0 %v598_v3  ;;  %v38_v14 = vld [vmem:[#allocation2 + $0x10] sm:$0xff]  ;;  %v602_v16 = vpack.c.bf16 %v55_v13, %v54_v11 }
  0x16   :  { %v632_v12 = vpack.c.bf16 %v69_v10, %v68_v9  ;;  %v39_v15 = vld [vmem:[#allocation2 + $0x18] sm:$0xff]  ;;  %601 = vmatpush3.bf16.msra.mxu0 %v600_v7  ;;  %v86_v18 = vld [vmem:[#allocation2 + $0x190] sm:$0xff]  ;;  %v56_v23 = vld [vmem:[#allocation2 + $0xa0] sm:$0xff] }
  0x17   :  { %631 = vmatprep.subr.bf16.mxu1 %v630_v8  ;;  %v604_v17 = vpack.c.bf16 %v39_v15, %v38_v14  ;;  %v87_v19 = vld [vmem:[#allocation2 + $0x198] sm:$0xff]  ;;  %v70_v20 = vld [vmem:[#allocation2 + $0x110] sm:$0xff]  ;;  %v57_v24 = vld [vmem:[#allocation2 + $0xa8] sm:$0xff]  ;;  %603 = vmatprep.subr.bf16.mxu0 %v602_v16 }
  0x18   :  { %633 = vmatpush3.bf16.msra.mxu1 %v632_v12  ;;  %v634_v21 = vpack.c.bf16 %v87_v19, %v86_v18  ;;  %v71_v22 = vld [vmem:[#allocation2 + $0x118] sm:$0xff]  ;;  %v606_v26 = vpack.c.bf16 %v57_v24, %v56_v23  ;;  %v40_v27 = vld [vmem:[#allocation2 + $0x20] sm:$0xff]  ;;  %v41_v28 = vld [vmem:[#allocation2 + $0x28] sm:$0xff] }
  0x19   :  { %v636_v25 = vpack.c.bf16 %v71_v22, %v70_v20  ;;  %v88_v29 = vld [vmem:[#allocation2 + $0x1a0] sm:$0xff]  ;;  %v89_v30 = vld [vmem:[#allocation2 + $0x1a8] sm:$0xff]  ;;  %v608_v33 = vpack.c.bf16 %v41_v28, %v40_v27  ;;  %v58_v35 = vld [vmem:[#allocation2 + $0xb0] sm:$0xff] }
  0x1a   :  { %635 = vmatprep.subr.bf16.mxu1 %v634_v21  ;;  %v72_v31 = vld [vmem:[#allocation2 + $0x120] sm:$0xff]  ;;  %v73_v32 = vld [vmem:[#allocation2 + $0x128] sm:$0xff]  ;;  %605 = vmatpush3.bf16.msra.mxu0 %v604_v17  ;;  %v638_v34 = vpack.c.bf16 %v89_v30, %v88_v29  ;;  %v59_v36 = vld [vmem:[#allocation2 + $0xb8] sm:$0xff] }
  0x1b   :  { %v42_v37 = vld [vmem:[#allocation2 + $0x30] sm:$0xff]  ;;  %607 = vmatprep.subr.bf16.mxu0 %v606_v26  ;;  %v640_v38 = vpack.c.bf16 %v73_v32, %v72_v31  ;;  %v610_v39 = vpack.c.bf16 %v59_v36, %v58_v35  ;;  %v43_v40 = vld [vmem:[#allocation2 + $0x38] sm:$0xff]  ;;  %v60_v46 = vld [vmem:[#allocation2 + $0xc0] sm:$0xff] }
  0x1c   :  { %637 = vmatpush3.bf16.msra.mxu1 %v636_v25  ;;  %v90_v41 = vld [vmem:[#allocation2 + $0x1b0] sm:$0xff]  ;;  %v91_v42 = vld [vmem:[#allocation2 + $0x1b8] sm:$0xff]  ;;  %v61_v47 = vld [vmem:[#allocation2 + $0xc8] sm:$0xff]  ;;  %v612_v48 = vpack.c.bf16 %v43_v40, %v42_v37 }
  0x1d   :  { %639 = vmatprep.subr.bf16.mxu1 %v638_v34  ;;  %v642_v43 = vpack.c.bf16 %v91_v42, %v90_v41  ;;  %v74_v44 = vld [vmem:[#allocation2 + $0x130] sm:$0xff]  ;;  %v75_v45 = vld [vmem:[#allocation2 + $0x138] sm:$0xff]  ;;  %v92_v49 = vld [vmem:[#allocation2 + $0x1c0] sm:$0xff]  ;;  %v614_v52 = vpack.c.bf16 %v61_v47, %v60_v46 }
  0x1e   :  { %609 = vmatpush3.bf16.msra.mxu0 %v608_v33  ;;  %v93_v50 = vld [vmem:[#allocation2 + $0x1c8] sm:$0xff]  ;;  %v644_v51 = vpack.c.bf16 %v75_v45, %v74_v44  ;;  %v44_v53 = vld [vmem:[#allocation2 + $0x40] sm:$0xff]  ;;  %v62_v58 = vld [vmem:[#allocation2 + $0xd0] sm:$0xff] }
  0x1f   :  { %611 = vmatprep.subr.bf16.mxu0 %v610_v39  ;;  %v45_v54 = vld [vmem:[#allocation2 + $0x48] sm:$0xff]  ;;  %v76_v55 = vld [vmem:[#allocation2 + $0x140] sm:$0xff]  ;;  %v646_v56 = vpack.c.bf16 %v93_v50, %v92_v49  ;;  %v63_v59 = vld [vmem:[#allocation2 + $0xd8] sm:$0xff] }
  0x20   :  { %641 = vmatpush3.bf16.msra.mxu1 %v640_v38  ;;  %v77_v57 = vld [vmem:[#allocation2 + $0x148] sm:$0xff]  ;;  %v94_v60 = vld [vmem:[#allocation2 + $0x1d0] sm:$0xff]  ;;  %v95_v61 = vld [vmem:[#allocation2 + $0x1d8] sm:$0xff]  ;;  %v616_v62 = vpack.c.bf16 %v45_v54, %v44_v53  ;;  %v618_v0 = vpack.c.bf16 %v63_v59, %v62_v58 }
  0x21   :  { %643 = vmatprep.subr.bf16.mxu1 %v642_v43  ;;  %v648_v63 = vpack.c.bf16 %v77_v57, %v76_v55  ;;  %v46_v1 = vld [vmem:[#allocation2 + $0x50] sm:$0xff]  ;;  %v47_v2 = vld [vmem:[#allocation2 + $0x58] sm:$0xff]  ;;  %v650_v4 = vpack.c.bf16 %v95_v61, %v94_v60  ;;  %v64_v6 = vld [vmem:[#allocation2 + $0xe0] sm:$0xff] }
  0x22   :  { %613 = vmatpush3.bf16.msra.mxu0 %v612_v48  ;;  %v78_v3 = vld [vmem:[#allocation2 + $0x150] sm:$0xff]  ;;  %v79_v5 = vld [vmem:[#allocation2 + $0x158] sm:$0xff]  ;;  %v65_v7 = vld [vmem:[#allocation2 + $0xe8] sm:$0xff]  ;;  %v620_v10 = vpack.c.bf16 %v47_v2, %v46_v1 }
  0x23   :  { %615 = vmatprep.subr.bf16.mxu0 %v614_v52  ;;  %v96_v8 = vld [vmem:[#allocation2 + $0x1e0] sm:$0xff]  ;;  %v97_v9 = vld [vmem:[#allocation2 + $0x1e8] sm:$0xff]  ;;  %v652_v13 = vpack.c.bf16 %v79_v5, %v78_v3  ;;  %v622_v14 = vpack.c.bf16 %v65_v7, %v64_v6  ;;  %v66_v19 = vld [vmem:[#allocation2 + $0xf0] sm:$0xff] }
  0x24   :  { %645 = vmatpush3.bf16.msra.mxu1 %v644_v51  ;;  %v48_v11 = vld [vmem:[#allocation2 + $0x60] sm:$0xff]  ;;  %v49_v12 = vld [vmem:[#allocation2 + $0x68] sm:$0xff]  ;;  %v654_v18 = vpack.c.bf16 %v97_v9, %v96_v8  ;;  %v67_v20 = vld [vmem:[#allocation2 + $0xf8] sm:$0xff] }
  0x25   :  { %647 = vmatprep.subr.bf16.mxu1 %v646_v56  ;;  %v80_v15 = vld [vmem:[#allocation2 + $0x160] sm:$0xff]  ;;  %v81_v16 = vld [vmem:[#allocation2 + $0x168] sm:$0xff]  ;;  %v31_v21 = vld [vmem:[%s818_s0 + $0x18] sm:$0xff]  ;;  %v624_v24 = vpack.c.bf16 %v49_v12, %v48_v11  ;;  %v626_v26 = vpack.c.bf16 %v67_v20, %v66_v19 }
  0x26   :  { %617 = vmatpush3.bf16.msra.mxu0 %v616_v62  ;;  %v29_v17 = vld [vmem:[%s818_s0 + $0x8] sm:$0xff]  ;;  %v98_v22 = vld [vmem:[#allocation2 + $0x1f0] sm:$0xff]  ;;  %v99_v23 = vld [vmem:[#allocation2 + $0x1f8] sm:$0xff]  ;;  %305 = vmatprep.mubr.f32.mxu1 %v31_v21  ;;  %v656_v25 = vpack.c.bf16 %v81_v16, %v80_v15 }
  0x27   :  { %619 = vmatprep.subr.bf16.mxu0 %v618_v0  ;;  %235 = vmatprep.mubr.f32.mxu0 %v29_v17  ;;  %v50_v27 = vld [vmem:[#allocation2 + $0x70] sm:$0xff]  ;;  %v51_v28 = vld [vmem:[#allocation2 + $0x78] sm:$0xff]  ;;  %v658_v30 = vpack.c.bf16 %v99_v23, %v98_v22  ;;  %v116_v32 = vld [vmem:[#allocation2 + $0x280] sm:$0xff] }
  0x28   :  { %649 = vmatpush3.bf16.msra.mxu1 %v648_v63  ;;  %v82_v29 = vld [vmem:[#allocation2 + $0x170] sm:$0xff]  ;;  %v83_v31 = vld [vmem:[#allocation2 + $0x178] sm:$0xff]  ;;  %v117_v33 = vld [vmem:[#allocation2 + $0x288] sm:$0xff]  ;;  %v628_v36 = vpack.c.bf16 %v51_v28, %v50_v27 }
  0x29   :  { %651 = vmatprep.subr.bf16.mxu1 %v650_v4  ;;  %v148_v34 = vld [vmem:[#allocation2 + $0x380] sm:$0xff]  ;;  %v149_v35 = vld [vmem:[#allocation2 + $0x388] sm:$0xff]  ;;  %v660_v37 = vpack.c.bf16 %v83_v31, %v82_v29  ;;  %v662_v38 = vpack.c.bf16 %v117_v33, %v116_v32  ;;  %v118_v44 = vld [vmem:[#allocation2 + $0x290] sm:$0xff] }
  0x2a   :  { %621 = vmatpush3.bf16.msra.mxu0 %v620_v10  ;;  %v100_v39 = vld [vmem:[#allocation2 + $0x200] sm:$0xff]  ;;  %v101_v40 = vld [vmem:[#allocation2 + $0x208] sm:$0xff]  ;;  %v694_v42 = vpack.c.bf16 %v149_v35, %v148_v34  ;;  %v119_v45 = vld [vmem:[#allocation2 + $0x298] sm:$0xff] }
  0x2b   :  { %623 = vmatprep.subr.bf16.mxu0 %v622_v14  ;;  %v132_v41 = vld [vmem:[#allocation2 + $0x300] sm:$0xff]  ;;  %v133_v43 = vld [vmem:[#allocation2 + $0x308] sm:$0xff]  ;;  %v150_v46 = vld [vmem:[#allocation2 + $0x390] sm:$0xff]  ;;  %v664_v49 = vpack.c.bf16 %v101_v40, %v100_v39  ;;  %v666_v52 = vpack.c.bf16 %v119_v45, %v118_v44 }
  0x2c   :  { %653 = vmatpush3.bf16.msra.mxu1 %v652_v13  ;;  %v151_v47 = vld [vmem:[#allocation2 + $0x398] sm:$0xff]  ;;  %v28_v48 = vld [vmem:[%s818_s0] sm:$0xff]  ;;  %v30_v50 = vld [vmem:[%s818_s0 + $0x10] sm:$0xff]  ;;  %v696_v51 = vpack.c.bf16 %v133_v43, %v132_v41 }
  0x2d   :  { %655 = vmatprep.subr.bf16.mxu1 %v654_v18  ;;  %v102_v53 = vld [vmem:[#allocation2 + $0x210] sm:$0xff]  ;;  %v103_v54 = vld [vmem:[#allocation2 + $0x218] sm:$0xff]  ;;  %v698_v56 = vpack.c.bf16 %v151_v47, %v150_v46  ;;  %v120_v58 = vld [vmem:[#allocation2 + $0x2a0] sm:$0xff] }
  0x2e   :  { %625 = vmatpush3.bf16.msra.mxu0 %v624_v24  ;;  %v134_v55 = vld [vmem:[#allocation2 + $0x310] sm:$0xff]  ;;  %v135_v57 = vld [vmem:[#allocation2 + $0x318] sm:$0xff]  ;;  %v121_v59 = vld [vmem:[#allocation2 + $0x2a8] sm:$0xff]  ;;  %v668_v62 = vpack.c.bf16 %v103_v54, %v102_v53 }
  0x2f   :  { %627 = vmatprep.subr.bf16.mxu0 %v626_v26  ;;  %v152_v60 = vld [vmem:[#allocation2 + $0x3a0] sm:$0xff]  ;;  %v153_v61 = vld [vmem:[#allocation2 + $0x3a8] sm:$0xff]  ;;  %v700_v63 = vpack.c.bf16 %v135_v57, %v134_v55  ;;  %v670_v0 = vpack.c.bf16 %v121_v59, %v120_v58  ;;  %v122_v6 = vld [vmem:[#allocation2 + $0x2b0] sm:$0xff] }
  0x30   :  { %657 = vmatpush3.bf16.msra.mxu1 %v656_v25  ;;  %v104_v1 = vld [vmem:[#allocation2 + $0x220] sm:$0xff]  ;;  %v105_v2 = vld [vmem:[#allocation2 + $0x228] sm:$0xff]  ;;  %v702_v4 = vpack.c.bf16 %v153_v61, %v152_v60  ;;  %v123_v7 = vld [vmem:[#allocation2 + $0x2b8] sm:$0xff] }
  0x31   :  { %659 = vmatprep.subr.bf16.mxu1 %v658_v30  ;;  %v136_v3 = vld [vmem:[#allocation2 + $0x320] sm:$0xff]  ;;  %v137_v5 = vld [vmem:[#allocation2 + $0x328] sm:$0xff]  ;;  %v154_v8 = vld [vmem:[#allocation2 + $0x3b0] sm:$0xff]  ;;  %v672_v10 = vpack.c.bf16 %v105_v2, %v104_v1  ;;  %v674_v12 = vpack.c.bf16 %v123_v7, %v122_v6 }
  0x32   :  { %629 = vmatpush3.bf16.msra.mxu0 %v628_v36  ;;  %v155_v9 = vld [vmem:[#allocation2 + $0x3b8] sm:$0xff]  ;;  %v704_v11 = vpack.c.bf16 %v137_v5, %v136_v3  ;;  %v106_v13 = vld [vmem:[#allocation2 + $0x230] sm:$0xff]  ;;  %v124_v18 = vld [vmem:[#allocation2 + $0x2c0] sm:$0xff] }
  0x33   :  { %663 = vmatprep.subr.bf16.mxu0 %v662_v38  ;;  %v107_v14 = vld [vmem:[#allocation2 + $0x238] sm:$0xff]  ;;  %v138_v15 = vld [vmem:[#allocation2 + $0x330] sm:$0xff]  ;;  %v706_v16 = vpack.c.bf16 %v155_v9, %v154_v8  ;;  %v125_v19 = vld [vmem:[#allocation2 + $0x2c8] sm:$0xff] }
  0x34   :  { %661 = vmatpush3.bf16.msra.mxu1 %v660_v37  ;;  %v139_v17 = vld [vmem:[#allocation2 + $0x338] sm:$0xff]  ;;  %v156_v20 = vld [vmem:[#allocation2 + $0x3c0] sm:$0xff]  ;;  %v157_v21 = vld [vmem:[#allocation2 + $0x3c8] sm:$0xff]  ;;  %v676_v22 = vpack.c.bf16 %v107_v14, %v106_v13  ;;  %v678_v26 = vpack.c.bf16 %v125_v19, %v124_v18 }
  0x35   :  { %695 = vmatprep.subr.bf16.mxu1 %v694_v42  ;;  %236 = vmatmul.mubr.f32.vlgmr.msra.gmra.mrb[0].mxu0 %v28_v48  ;;  %v33_v23 = vld [vmem:[%s818_s0 + $0x28] sm:$0xff]  ;;  %v35_v24 = vld [vmem:[%s818_s0 + $0x38] sm:$0xff]  ;;  %v708_v25 = vpack.c.bf16 %v139_v17, %v138_v15  ;;  %v108_v27 = vld [vmem:[#allocation2 + $0x240] sm:$0xff]  ;;  %v710_v30 = vpack.c.bf16 %v157_v21, %v156_v20 }
  0x36   :  { %665 = vmatpush3.bf16.msra.mxu0 %v664_v49  ;;  %v109_v28 = vld [vmem:[#allocation2 + $0x248] sm:$0xff]  ;;  %v140_v29 = vld [vmem:[#allocation2 + $0x340] sm:$0xff]  ;;  %v126_v32 = vld [vmem:[#allocation2 + $0x2d0] sm:$0xff]  ;;  %375 = vmatprep.mubr.f32.mxu0 %v33_v23 }
  0x37   :  { %306 = vmatmul.mubr.f32.vlgmr.msra.gmra.mrb[0].mxu1 %v30_v50  ;;  %667 = vmatprep.subr.bf16.mxu0 %v666_v52  ;;  %v141_v31 = vld [vmem:[#allocation2 + $0x348] sm:$0xff]  ;;  %v127_v33 = vld [vmem:[#allocation2 + $0x2d8] sm:$0xff]  ;;  %v158_v34 = vld [vmem:[#allocation2 + $0x3d0] sm:$0xff]  ;;  %v680_v36 = vpack.c.bf16 %v109_v28, %v108_v27 }
  0x38   :  { %697 = vmatpush3.bf16.msra.mxu1 %v696_v51  ;;  %v159_v35 = vld [vmem:[#allocation2 + $0x3d8] sm:$0xff]  ;;  %445 = vmatprep.mubr.f32.mxu1 %v35_v24  ;;  %v712_v37 = vpack.c.bf16 %v141_v31, %v140_v29  ;;  %v682_v38 = vpack.c.bf16 %v127_v33, %v126_v32  ;;  %v110_v39 = vld [vmem:[#allocation2 + $0x250] sm:$0xff]  ;;  %v128_v44 = vld [vmem:[#allocation2 + $0x2e0] sm:$0xff] }
  0x39   :  { %699 = vmatprep.subr.bf16.mxu1 %v698_v56  ;;  %v111_v40 = vld [vmem:[#allocation2 + $0x258] sm:$0xff]  ;;  %v142_v41 = vld [vmem:[#allocation2 + $0x350] sm:$0xff]  ;;  %v714_v42 = vpack.c.bf16 %v159_v35, %v158_v34  ;;  %v129_v45 = vld [vmem:[#allocation2 + $0x2e8] sm:$0xff] }
  0x3a   :  { %669 = vmatpush3.bf16.msra.mxu0 %v668_v62  ;;  %v143_v43 = vld [vmem:[#allocation2 + $0x358] sm:$0xff]  ;;  %v160_v46 = vld [vmem:[#allocation2 + $0x3e0] sm:$0xff]  ;;  %v161_v47 = vld [vmem:[#allocation2 + $0x3e8] sm:$0xff]  ;;  %v684_v48 = vpack.c.bf16 %v111_v40, %v110_v39  ;;  %v686_v50 = vpack.c.bf16 %v129_v45, %v128_v44 }
  0x3b   :  { %671 = vmatprep.subr.bf16.mxu0 %v670_v0  ;;  %v716_v49 = vpack.c.bf16 %v143_v43, %v142_v41  ;;  %v112_v51 = vld [vmem:[#allocation2 + $0x260] sm:$0xff]  ;;  %v113_v52 = vld [vmem:[#allocation2 + $0x268] sm:$0xff]  ;;  %v718_v54 = vpack.c.bf16 %v161_v47, %v160_v46  ;;  %v130_v56 = vld [vmem:[#allocation2 + $0x2f0] sm:$0xff] }
  0x3c   :  { %701 = vmatpush3.bf16.msra.mxu1 %v700_v63  ;;  %v144_v53 = vld [vmem:[#allocation2 + $0x360] sm:$0xff]  ;;  %v145_v55 = vld [vmem:[#allocation2 + $0x368] sm:$0xff]  ;;  %v131_v57 = vld [vmem:[#allocation2 + $0x2f8] sm:$0xff]  ;;  %v688_v60 = vpack.c.bf16 %v113_v52, %v112_v51 }
  0x3d   :  { %703 = vmatprep.subr.bf16.mxu1 %v702_v4  ;;  %v162_v58 = vld [vmem:[#allocation2 + $0x3f0] sm:$0xff]  ;;  %v163_v59 = vld [vmem:[#allocation2 + $0x3f8] sm:$0xff]  ;;  %v720_v61 = vpack.c.bf16 %v145_v55, %v144_v53  ;;  %v690_v62 = vpack.c.bf16 %v131_v57, %v130_v56  ;;  %v32_v6 = vld [vmem:[%s818_s0 + $0x20] sm:$0xff] }
  0x3e   :  { %673 = vmatpush3.bf16.msra.mxu0 %v672_v10  ;;  %v114_v63 = vld [vmem:[#allocation2 + $0x270] sm:$0xff]  ;;  %v115_v0 = vld [vmem:[#allocation2 + $0x278] sm:$0xff]  ;;  %v722_v1 = vpack.c.bf16 %v163_v59, %v162_v58  ;;  %v457_v9 = vld [vmem:[%s820_s2] ss:$0 sm:$0xff] }
  0x3f   :  { %675 = vmatprep.subr.bf16.mxu0 %v674_v12  ;;  %v146_v2 = vld [vmem:[#allocation2 + $0x370] sm:$0xff]  ;;  %v147_v3 = vld [vmem:[#allocation2 + $0x378] sm:$0xff]  ;;  %v692_v4 = vpack.c.bf16 %v115_v0, %v114_v63 }
  0x40   :  { %705 = vmatpush3.bf16.msra.mxu1 %v704_v11  ;;  %v724_v5 = vpack.c.bf16 %v147_v3, %v146_v2  ;;  %v34_v7 = vld [vmem:[%s818_s0 + $0x30] sm:$0xff] }
  0x41   :  { %707 = vmatprep.subr.bf16.mxu1 %v706_v16 }
  0x42   :  { %677 = vmatpush3.bf16.msra.mxu0 %v676_v22 }
  0x43   :  { %679 = vmatprep.subr.bf16.mxu0 %v678_v26 }
  0x44   :  { %709 = vmatpush3.bf16.msra.mxu1 %v708_v25 }
  0x45   :  { %711 = vmatprep.subr.bf16.mxu1 %v710_v30 }
  0x46   :  { %681 = vmatpush3.bf16.msra.mxu0 %v680_v36 }
  0x47   :  { %683 = vmatprep.subr.bf16.mxu0 %v682_v38 }
  0x48   :  { %713 = vmatpush3.bf16.msra.mxu1 %v712_v37 }
  0x49   :  { %715 = vmatprep.subr.bf16.mxu1 %v714_v42 }
  0x4a   :  { %685 = vmatpush3.bf16.msra.mxu0 %v684_v48 }
  0x4b   :  { %687 = vmatprep.subr.bf16.mxu0 %v686_v50 }
  0x4c   :  { %717 = vmatpush3.bf16.msra.mxu1 %v716_v49 }
  0x4d   :  { %719 = vmatprep.subr.bf16.mxu1 %v718_v54 }
  0x4e   :  { %689 = vmatpush3.bf16.msra.mxu0 %v688_v60 }
  0x4f   :  { %691 = vmatprep.subr.bf16.mxu0 %v690_v62 }
  0x50   :  { %721 = vmatpush3.bf16.msra.mxu1 %v720_v61 }
  0x51   :  { %723 = vmatprep.subr.bf16.mxu1 %v722_v1 }
  0x52   :  { %693 = vmatpush3.bf16.msra.mxu0 %v692_v4 }
  0x54   :  { %725 = vmatpush3.bf16.msra.mxu1 %v724_v5 }
  0x55   :  { %376 = vmatmul.mubr.f32.vlgmr.msra.gmra.mrb[2].mxu0 %v32_v6 }
  0x57   :  { %446 = vmatmul.mubr.f32.vlgmr.msra.gmra.mrb[2].mxu1 %v34_v7 }
 0x108   :  { %v490_v8 = vpop.f32.mrb[0].mxu0 }
 0x109   :  { %v491_v10 = vpop.f32.mrb[1].mxu0 }
 0x10a   :  { %v525_v11 = vpop.f32.mrb[0].mxu1  ;;  %v492_v12 = vadd.f32 %v491_v10, %v490_v8 }
 0x10b   :  { %v526_v13 = vpop.f32.mrb[1].mxu1 }
 0x10c   :  { %v527_v14 = vadd.f32 %v526_v13, %v525_v11  ;;  %v238_v15 = vadd.f32 %v492_v12, %v457_v9 }
 0x10e   :  { %v308_v16 = vadd.f32 %v527_v14, %v238_v15 }
 0x128   :  { %v560_v17 = vpop.f32.mrb[2].mxu0 }
 0x129   :  { %v561_v18 = vpop.f32.mrb[3].mxu0 }
 0x12a   :  { %v595_v19 = vpop.f32.mrb[2].mxu1  ;;  %v562_v20 = vadd.f32 %v561_v18, %v560_v17 }
 0x12b   :  { %v596_v21 = vpop.f32.mrb[3].mxu1 }
 0x12c   :  { %v597_v22 = vadd.f32 %v596_v21, %v595_v19  ;;  %v378_v23 = vadd.f32 %v562_v20, %v308_v16 }
 0x12e   :  { %v448_v24 = vadd.f32 %v597_v22, %v378_v23 }
 0x130   :  { %451 = vst [vmem:[%s821_s3] sm:$0xff] %v448_v24 }
 0x131   :  { %456 = vsyncpa [#allocation3], 1 }

</bundles_post_ra>
